<compile_context>
chip_gen: v7x
topology: tpu7x:2x2x1
jax: 0.10.0
libtpu: 0.0.40
codegen_flags: <defaults>
</compile_context>

<pallas_src>
import functools

import jax
import jax.numpy as jnp
from jax import lax
from jax.experimental import pallas as pl
from jax.experimental.pallas import tpu as pltpu


def _round_up(x, m):
    return (x + m - 1) // m * m


@functools.lru_cache(maxsize=1)
def _vmem_budget_bytes():
    """Generation-aware VMEM budget (~78% of per-core capacity)."""
    try:
        cap = int(pltpu.get_tpu_info().vmem_capacity_bytes)
    except Exception:  # interpret mode / older runtimes
        cap = 128 * 2 ** 20
    return int(0.78 * cap)


def _pick_tile(d, cap):
    """Pick (k_tile, padded_dim): k_tile is a multiple of 128.

    Prefers a tile that divides the 128-rounded dim (no extra HBM pad copy);
    otherwise falls back to `cap` and pads the dim to a multiple of it.
    """
    d128 = _round_up(max(int(d), 1), 128)
    cap = max(128, (min(int(cap), d128) // 128) * 128)
    if d128 <= cap:
        return d128, d128                      # single tile, minimal padding
    for t in range(cap, cap // 2, -128):       # big divisor -> no extra pad
        if d128 % t == 0:
            return t, d128
    return cap, _round_up(d128, cap)           # pad to a multiple of cap


def _pad_last(x, to):
    pad = to - x.shape[-1]
    if pad:
        x = jnp.pad(x, ((0, 0), (0, pad)))     # zeros: no effect on matmul/|x|
    return x


def _logsumexp(x, axis):
    m = jnp.max(x, axis=axis)
    return m + jnp.log(jnp.sum(jnp.exp(x - jnp.expand_dims(m, axis)), axis=axis))


def _bice_stream_kernel(nkp, nks, nkd, total,
                        st_ref, si_ref, dt_ref, di_ref,
                        s_out, d_out, l1q_out, l1d_out):
    """One (split p, K-step k) of the streaming reduction.

    st/si : (B, tk_s) sparse text / image tiles (native dtype, e.g. bf16)
    dt/di : (B, tk_d) dense  text / image tiles
    s_out, d_out     : (1, B, B) f32 partial score accumulators for split p
    l1q_out, l1d_out : (1, B, 1) f32 partial per-row L1 accumulators
    """
    p = pl.program_id(0)
    k = pl.program_id(1)
    g = p * nkp + k                     # global K-tile index

    @pl.when(k == 0)
    def _init():
        s_out[...] = jnp.zeros_like(s_out)
        d_out[...] = jnp.zeros_like(d_out)
        l1q_out[...] = jnp.zeros_like(l1q_out)
        l1d_out[...] = jnp.zeros_like(l1d_out)

    # Contract the feature (last) dim of both operands: A @ B.T on the MXU
    # without materializing a transpose.
    contract = (((1,), (1,)), ((), ()))

    def sparse_step():
        st = st_ref[...]
        si = si_ref[...]
        s_out[0, :, :] += lax.dot_general(
            si, st, contract, preferred_element_type=jnp.float32)
        # Tiny L1 partials interleave with the matmul tile (hidden under
        # MXU/DMA time; kept minimal for v5e's weaker VPU).
        l1q_out[0, :, :] += jnp.sum(jnp.abs(st).astype(jnp.float32), axis=-1,
                                    keepdims=True)
        l1d_out[0, :, :] += jnp.sum(jnp.abs(si).astype(jnp.float32), axis=-1,
                                    keepdims=True)

    def dense_step():
        d_out[0, :, :] += lax.dot_general(
            di_ref[...], dt_ref[...], contract,
            preferred_element_type=jnp.float32)

    # Static gating: only emit pl.when if a side really has fewer tiles.
    if nks == total:
        sparse_step()
    else:
        pl.when(g < nks)(sparse_step)
    if nkd == total:
        dense_step()
    else:
        pl.when(g < nkd)(dense_step)


@functools.partial(jax.jit, static_argnames=("temp", "tk_max", "num_splits"))
def bice_loss_pallas(sparse_texts, sparse_imgs, dense_texts, dense_imgs,
                     reg_weights, *, temp=0.001, tk_max=2048, num_splits=2):
    # Inputs stream in their NATIVE dtype.  Caller contract for best perf:
    # provide bf16 embeddings and a batch B that is a multiple of 8 (ideally
    # 128) -- padding/casting here would add its own HBM round trips.
    B, d_sparse = sparse_texts.shape
    _, d_dense = dense_texts.shape
    f32 = jnp.float32

    budget = _vmem_budget_bytes()

    # K-tile cap: halve until double-buffered tiles + (B,B) accumulator
    # blocks fit the per-generation VMEM budget (v5e/v6e 128 MiB, v7x 64 MiB).
    tk_cap = int(tk_max)
    while True:
        tk_s, dp_s = _pick_tile(d_sparse, tk_cap)
        tk_d, dp_d = _pick_tile(d_dense, tk_cap)
        est = (4 * B * tk_s * sparse_texts.dtype.itemsize      # 2 streams x 2 bufs
               + 4 * B * tk_d * dense_texts.dtype.itemsize
               + 4 * B * B * 4                                 # 2 acc outs x 2 bufs
               + 16 * B * 4 + (1 << 20))
        if est <= budget or tk_s <= 128:
            break
        tk_cap //= 2

    st = _pad_last(sparse_texts, dp_s)
    si = _pad_last(sparse_imgs, dp_s)
    dt = _pad_last(dense_texts, dp_d)
    di = _pad_last(dense_imgs, dp_d)

    nks = dp_s // tk_s
    nkd = dp_d // tk_d
    nk = max(nks, nkd)

    # Leading "parallel" split of the K reduction: on v7x each TensorCore
    # takes half the K tiles (HBM-bound -> up to ~2x); on 1-TC chips the only
    # cost is one extra (B,B) partial writeback summed below.
    nsplit = max(1, min(int(num_splits), nk))
    nkp = -(-nk // nsplit)
    total = nsplit * nkp

    # Shorter side: clamp block index (pipeline skips re-copying an unchanged
    # block) and gate its accumulation inside the kernel.
    sp_map = lambda p, k: (0, jnp.minimum(p * nkp + k, nks - 1))
    de_map = lambda p, k: (0, jnp.minimum(p * nkp + k, nkd - 1))
    acc_map = lambda p, k: (p, 0, 0)

    kernel = functools.partial(_bice_stream_kernel, nkp, nks, nkd, total)

    s_parts, d_parts, l1q_parts, l1d_parts = pl.pallas_call(
        kernel,
        out_shape=(jax.ShapeDtypeStruct((nsplit, B, B), f32),
                   jax.ShapeDtypeStruct((nsplit, B, B), f32),
                   jax.ShapeDtypeStruct((nsplit, B, 1), f32),
                   jax.ShapeDtypeStruct((nsplit, B, 1), f32)),
        grid_spec=pltpu.PrefetchScalarGridSpec(
            num_scalar_prefetch=0,
            grid=(nsplit, nkp),
            in_specs=[pl.BlockSpec((B, tk_s), sp_map),
                      pl.BlockSpec((B, tk_s), sp_map),
                      pl.BlockSpec((B, tk_d), de_map),
                      pl.BlockSpec((B, tk_d), de_map)],
            out_specs=[pl.BlockSpec((1, B, B), acc_map),
                       pl.BlockSpec((1, B, B), acc_map),
                       pl.BlockSpec((1, B, 1), acc_map),
                       pl.BlockSpec((1, B, 1), acc_map)]),
        compiler_params=pltpu.CompilerParams(
            dimension_semantics=("parallel", "arbitrary"),
            vmem_limit_bytes=int(budget)),
    )(st, si, dt, di)

    # ---- tiny finalize on (B,B) f32 in plain JAX (fused/overlapped by XLA) ----
    s = jnp.sum(s_parts, axis=0)            # student i2t scores: imgs x txts
    d = jnp.sum(d_parts, axis=0)            # teacher i2t scores
    d_scaled = d * f32(1.0 / temp)

    # Exact per-axis-max softmax / logsumexp: teacher targets at temp=0.001
    # are near one-hot, so no approximate reciprocal here.
    p_i2t = jax.nn.softmax(d_scaled, axis=1)
    p_t2i = jax.nn.softmax(d_scaled, axis=0)
    lse1 = _logsumexp(s, axis=1)            # (B,) row logsumexp (i2t direction)
    lse0 = _logsumexp(s, axis=0)            # (B,) col logsumexp (t2i direction)

    inv_b = f32(1.0 / B)
    # CE(logits, soft targets) = mean_i lse_i - (1/B) sum(p * s)   (rows of p sum to 1)
    ce_i2t = jnp.mean(lse1) - jnp.sum(p_i2t * s) * inv_b
    ce_t2i = jnp.mean(lse0) - jnp.sum(p_t2i * s) * inv_b
    loss = 0.5 * (ce_i2t + ce_t2i)

    mean_l1_q = jnp.sum(l1q_parts) * inv_b  # mean_i sum_j |sparse_texts|
    mean_l1_d = jnp.sum(l1d_parts) * inv_b  # mean_i sum_j |sparse_imgs|
    reg = 0.5 * (reg_weights[0] * mean_l1_q + reg_weights[1] * mean_l1_d)
    return loss, reg


class BICELossPallas:
    """Mirrors BICELoss(nn.Module): stateful L1-warmup step counters on host."""

    def __init__(self, temp=0.001, q_reg=0.0, d_reg=0.0, T=1000,
                 tk_max=2048, num_splits=2):
        self.temp = float(temp)
        self.q_reg = float(q_reg)
        self.d_reg = float(d_reg)
        self.T = int(T)
        self.tk_max = int(tk_max)
        self.num_splits = int(num_splits)
        self._q_step = 0
        self._d_step = 0

    def _l1_weight(self, base, step):
        # TODO(synk): the reference L1 regularizer class is not provided;
        # using the standard quadratic warmup w_t = w * min(step/T, 1)^2
        # over a per-row L1 norm (mean over batch of sum |x|).
        frac = min(step, self.T) / float(self.T)
        return base * frac * frac

    def __call__(self, sparse_texts, sparse_imgs, dense_texts, dense_imgs):
        reg_w = jnp.array(
            [self._l1_weight(self.q_reg, self._q_step),
             self._l1_weight(self.d_reg, self._d_step)],
            dtype=jnp.float32)
        loss, reg = bice_loss_pallas(sparse_texts, sparse_imgs,
                                     dense_texts, dense_imgs, reg_w,
                                     temp=self.temp, tk_max=self.tk_max,
                                     num_splits=self.num_splits)
        self._q_step += 1   # q_regularizer.step()
        self._d_step += 1   # d_regularizer.step()
        return loss, reg


def _bice_loss_ref(st, si, dt, di, q_w, d_w, temp):
    """Pure-JAX reference matching the torch forward."""
    s_i2t = si @ st.T
    s_t2i = s_i2t.T
    d_i2t = di @ dt.T
    p_i2t = jax.nn.softmax(d_i2t / temp, axis=1)
    p_t2i = jax.nn.softmax(d_i2t.T / temp, axis=1)

    def ce(logits, tgt):
        return jnp.mean(-jnp.sum(tgt * jax.nn.log_softmax(logits, axis=1),
                                 axis=1))

    loss = 0.5 * (ce(s_i2t, p_i2t) + ce(s_t2i, p_t2i))
    reg = 0.5 * (q_w * jnp.mean(jnp.sum(jnp.abs(st), axis=1)) +
                 d_w * jnp.mean(jnp.sum(jnp.abs(si), axis=1)))
    return loss, reg


if __name__ == "__main__":
    key = jax.random.PRNGKey(0)
    k1, k2, k3, k4 = jax.random.split(key, 4)

    # Small demo shapes; D_SPARSE > tk exercises the split K-reduction grid
    # (nsplit=2, nks=2) plus the clamped / gated dense side (nkd=1).
    B, D_SPARSE, D_DENSE = 8, 160, 64
    # sparse embeddings are non-negative (ReLU-style sparse lexical vectors)
    sparse_texts = jax.nn.relu(jax.random.normal(k1, (B, D_SPARSE), jnp.float32))
    sparse_imgs = jax.nn.relu(jax.random.normal(k2, (B, D_SPARSE), jnp.float32))
    dense_texts = jax.random.normal(k3, (B, D_DENSE), jnp.float32)
    dense_imgs = jax.random.normal(k4, (B, D_DENSE), jnp.float32)

    loss_mod = BICELossPallas(temp=0.001, q_reg=0.01, d_reg=0.01, T=1000,
                              tk_max=128)
    # Advance the warmup so the regularizer weight is non-zero for the check.
    loss_mod._q_step = 500
    loss_mod._d_step = 500

    loss, reg = loss_mod(sparse_texts, sparse_imgs, dense_texts, dense_imgs)
    loss, reg = jax.block_until_ready((loss, reg))

    q_w = loss_mod._l1_weight(0.01, 500)
    d_w = loss_mod._l1_weight(0.01, 500)
    ref_loss, ref_reg = _bice_loss_ref(sparse_texts, sparse_imgs,
                                       dense_texts, dense_imgs,
                                       q_w, d_w, 0.001)
    assert jnp.allclose(loss, ref_loss, rtol=2e-3, atol=2e-3), (loss, ref_loss)
    assert jnp.allclose(reg, ref_reg, rtol=1e-4, atol=1e-6), (reg, ref_reg)

    # Single-tile / single-split path (default tk_max).
    reg_w = jnp.array([q_w, d_w], jnp.float32)
    loss2, reg2 = bice_loss_pallas(sparse_texts, sparse_imgs,
                                   dense_texts, dense_imgs, reg_w, temp=0.001)
    loss2, reg2 = jax.block_until_ready((loss2, reg2))
    assert jnp.allclose(loss2, ref_loss, rtol=2e-3, atol=2e-3), (loss2, ref_loss)
    assert jnp.allclose(reg2, ref_reg, rtol=1e-4, atol=1e-6), (reg2, ref_reg)

    # bf16 streaming path (the intended production dtype): smoke test only --
    # at temp=0.001 the teacher targets are near one-hot, so bf16 input
    # rounding can legitimately move the loss vs the f32 reference.
    bf = jnp.bfloat16
    loss3, reg3 = bice_loss_pallas(sparse_texts.astype(bf),
                                   sparse_imgs.astype(bf),
                                   dense_texts.astype(bf),
                                   dense_imgs.astype(bf),
                                   reg_w, temp=0.001)
    loss3, reg3 = jax.block_until_ready((loss3, reg3))
    assert bool(jnp.isfinite(loss3)) and bool(jnp.isfinite(reg3))

    print("KERNEL_OK")
</pallas_src>

<mosaic_0001>
module attributes {stable_mosaic.version = 11 : i64} {
  func.func @_bice_stream_kernel(%arg0: i32, %arg1: i32, %arg2: memref<8x128xf32, #tpu.memory_space<vmem>>, %arg3: memref<8x128xf32, #tpu.memory_space<vmem>>, %arg4: memref<8x128xf32, #tpu.memory_space<vmem>>, %arg5: memref<8x128xf32, #tpu.memory_space<vmem>>, %arg6: memref<1x8x8xf32, #tpu.memory_space<vmem>>, %arg7: memref<1x8x8xf32, #tpu.memory_space<vmem>>, %arg8: memref<1x8x1xf32, #tpu.memory_space<vmem>>, %arg9: memref<1x8x1xf32, #tpu.memory_space<vmem>>) attributes {dimension_semantics = [#tpu.dimension_semantics<parallel>, #tpu.dimension_semantics<arbitrary>], iteration_bounds = array<i64: 2, 1>, scalar_prefetch = 0 : i64, scratch_operands = 0 : i64, tpu.core_type = #tpu.core_type<tc>, window_params = [{transform_indices = @transform_0, window_bounds = array<i64: 8, 128>}, {transform_indices = @transform_1, window_bounds = array<i64: 8, 128>}, {transform_indices = @transform_2, window_bounds = array<i64: 8, 128>}, {transform_indices = @transform_3, window_bounds = array<i64: 8, 128>}, {transform_indices = @transform_4, window_bounds = array<i64: 1, 8, 8>}, {transform_indices = @transform_5, window_bounds = array<i64: 1, 8, 8>}, {transform_indices = @transform_6, window_bounds = array<i64: 1, 8, 1>}, {transform_indices = @transform_7, window_bounds = array<i64: 1, 8, 1>}]} {
    %c1_i32 = arith.constant 1 : i32
    %0 = arith.muli %arg0, %c1_i32 : i32
    %1 = arith.addi %0, %arg1 : i32
    %c0_i32 = arith.constant 0 : i32
    %2 = arith.cmpi eq, %arg1, %c0_i32 : i32
    %3 = arith.extui %2 : i1 to i32
    %c0_i32_0 = arith.constant 0 : i32
    %4 = arith.cmpi ne, %3, %c0_i32_0 : i32
    scf.if %4 {
      %cst_26 = arith.constant 0.000000e+00 : f32
      %35 = vector.broadcast %cst_26 : f32 to vector<1x8x8xf32>
      %c0_27 = arith.constant 0 : index
      %c0_28 = arith.constant 0 : index
      %c0_29 = arith.constant 0 : index
      %36 = vector.load %arg6[%c0_27, %c0_28, %c0_29] : memref<1x8x8xf32, #tpu.memory_space<vmem>>, vector<1x8x8xf32>
      tpu.vector_store %arg6[%c0_27, %c0_28, %c0_29], %35 {strides = array<i32>} : memref<1x8x8xf32, #tpu.memory_space<vmem>>, vector<1x8x8xf32>,
      %cst_30 = arith.constant 0.000000e+00 : f32
      %37 = vector.broadcast %cst_30 : f32 to vector<1x8x8xf32>
      %c0_31 = arith.constant 0 : index
      %c0_32 = arith.constant 0 : index
      %c0_33 = arith.constant 0 : index
      %38 = vector.load %arg7[%c0_31, %c0_32, %c0_33] : memref<1x8x8xf32, #tpu.memory_space<vmem>>, vector<1x8x8xf32>
      tpu.vector_store %arg7[%c0_31, %c0_32, %c0_33], %37 {strides = array<i32>} : memref<1x8x8xf32, #tpu.memory_space<vmem>>, vector<1x8x8xf32>,
      %cst_34 = arith.constant 0.000000e+00 : f32
      %39 = vector.broadcast %cst_34 : f32 to vector<1x8x1xf32>
      %c0_35 = arith.constant 0 : index
      %c0_36 = arith.constant 0 : index
      %c0_37 = arith.constant 0 : index
      %40 = vector.load %arg8[%c0_35, %c0_36, %c0_37] : memref<1x8x1xf32, #tpu.memory_space<vmem>>, vector<1x8x1xf32>
      tpu.vector_store %arg8[%c0_35, %c0_36, %c0_37], %39 {strides = array<i32>} : memref<1x8x1xf32, #tpu.memory_space<vmem>>, vector<1x8x1xf32>,
      %cst_38 = arith.constant 0.000000e+00 : f32
      %41 = vector.broadcast %cst_38 : f32 to vector<1x8x1xf32>
      %c0_39 = arith.constant 0 : index
      %c0_40 = arith.constant 0 : index
      %c0_41 = arith.constant 0 : index
      %42 = vector.load %arg9[%c0_39, %c0_40, %c0_41] : memref<1x8x1xf32, #tpu.memory_space<vmem>>, vector<1x8x1xf32>
      tpu.vector_store %arg9[%c0_39, %c0_40, %c0_41], %41 {strides = array<i32>} : memref<1x8x1xf32, #tpu.memory_space<vmem>>, vector<1x8x1xf32>,
    } else {
    }
    %c0 = arith.constant 0 : index
    %c0_1 = arith.constant 0 : index
    %5 = vector.load %arg2[%c0, %c0_1] : memref<8x128xf32, #tpu.memory_space<vmem>>, vector<8x128xf32>
    %c0_2 = arith.constant 0 : index
    %c0_3 = arith.constant 0 : index
    %6 = vector.load %arg3[%c0_2, %c0_3] : memref<8x128xf32, #tpu.memory_space<vmem>>, vector<8x128xf32>
    %c0_4 = arith.constant 0 : index
    %c0_5 = arith.constant 0 : index
    %c0_6 = arith.constant 0 : index
    %7 = vector.load %arg6[%c0_4, %c0_5, %c0_6] : memref<1x8x8xf32, #tpu.memory_space<vmem>>, vector<1x8x8xf32>
    %8 = vector.shape_cast %7 : vector<1x8x8xf32> to vector<8x8xf32>
    %cst = arith.constant dense<0.000000e+00> : vector<8x8xf32>
    %9 = tpu.matmul %6, %5, %cst {dimension_numbers = #tpu.dot_dimension_numbers<[1], [1], [0], [0], [0, 0, 1, 0], [], []>} : vector<8x128xf32>, vector<8x128xf32>, vector<8x8xf32> -> vector<8x8xf32>
    %10 = arith.addf %8, %9 : vector<8x8xf32>
    %c0_7 = arith.constant 0 : index
    %c0_8 = arith.constant 0 : index
    %c0_9 = arith.constant 0 : index
    %11 = vector.load %arg6[%c0_7, %c0_8, %c0_9] : memref<1x8x8xf32, #tpu.memory_space<vmem>>, vector<1x8x8xf32>
    %12 = vector.shape_cast %11 : vector<1x8x8xf32> to vector<8x8xf32>
    %13 = vector.shape_cast %10 : vector<8x8xf32> to vector<1x8x8xf32>
    tpu.vector_store %arg6[%c0_7, %c0_8, %c0_9], %13 {strides = array<i32>} : memref<1x8x8xf32, #tpu.memory_space<vmem>>, vector<1x8x8xf32>,
    %c0_10 = arith.constant 0 : index
    %c0_11 = arith.constant 0 : index
    %c0_12 = arith.constant 0 : index
    %14 = vector.load %arg8[%c0_10, %c0_11, %c0_12] : memref<1x8x1xf32, #tpu.memory_space<vmem>>, vector<1x8x1xf32>
    %15 = vector.shape_cast %14 : vector<1x8x1xf32> to vector<8x1xf32>
    %16 = math.absf %5 : vector<8x128xf32>
    %cst_13 = arith.constant dense<0.000000e+00> : vector<8xf32>
    %17 = vector.multi_reduction <add>, %16, %cst_13 [1] : vector<8x128xf32> to vector<8xf32>
    %18 = vector.shape_cast %17 : vector<8xf32> to vector<8x1xf32>
    %19 = arith.addf %15, %18 : vector<8x1xf32>
    %c0_14 = arith.constant 0 : index
    %c0_15 = arith.constant 0 : index
    %c0_16 = arith.constant 0 : index
    %20 = vector.load %arg8[%c0_14, %c0_15, %c0_16] : memref<1x8x1xf32, #tpu.memory_space<vmem>>, vector<1x8x1xf32>
    %21 = vector.shape_cast %20 : vector<1x8x1xf32> to vector<8x1xf32>
    %22 = vector.shape_cast %19 : vector<8x1xf32> to vector<1x8x1xf32>
    tpu.vector_store %arg8[%c0_14, %c0_15, %c0_16], %22 {strides = array<i32>} : memref<1x8x1xf32, #tpu.memory_space<vmem>>, vector<1x8x1xf32>,
    %c0_17 = arith.constant 0 : index
    %c0_18 = arith.constant 0 : index
    %c0_19 = arith.constant 0 : index
    %23 = vector.load %arg9[%c0_17, %c0_18, %c0_19] : memref<1x8x1xf32, #tpu.memory_space<vmem>>, vector<1x8x1xf32>
    %24 = vector.shape_cast %23 : vector<1x8x1xf32> to vector<8x1xf32>
    %25 = math.absf %6 : vector<8x128xf32>
    %cst_20 = arith.constant dense<0.000000e+00> : vector<8xf32>
    %26 = vector.multi_reduction <add>, %25, %cst_20 [1] : vector<8x128xf32> to vector<8xf32>
    %27 = vector.shape_cast %26 : vector<8xf32> to vector<8x1xf32>
    %28 = arith.addf %24, %27 : vector<8x1xf32>
    %c0_21 = arith.constant 0 : index
    %c0_22 = arith.constant 0 : index
    %c0_23 = arith.constant 0 : index
    %29 = vector.load %arg9[%c0_21, %c0_22, %c0_23] : memref<1x8x1xf32, #tpu.memory_space<vmem>>, vector<1x8x1xf32>
    %30 = vector.shape_cast %29 : vector<1x8x1xf32> to vector<8x1xf32>
    %31 = vector.shape_cast %28 : vector<8x1xf32> to vector<1x8x1xf32>
    tpu.vector_store %arg9[%c0_21, %c0_22, %c0_23], %31 {strides = array<i32>} : memref<1x8x1xf32, #tpu.memory_space<vmem>>, vector<1x8x1xf32>,
    %c1_i32_24 = arith.constant 1 : i32
    %32 = arith.cmpi slt, %1, %c1_i32_24 : i32
    %33 = arith.extui %32 : i1 to i32
    %c0_i32_25 = arith.constant 0 : i32
    %34 = arith.cmpi ne, %33, %c0_i32_25 : i32
    scf.if %34 {
      %c0_26 = arith.constant 0 : index
      %c0_27 = arith.constant 0 : index
      %c0_28 = arith.constant 0 : index
      %35 = vector.load %arg7[%c0_26, %c0_27, %c0_28] : memref<1x8x8xf32, #tpu.memory_space<vmem>>, vector<1x8x8xf32>
      %36 = vector.shape_cast %35 : vector<1x8x8xf32> to vector<8x8xf32>
      %c0_29 = arith.constant 0 : index
      %c0_30 = arith.constant 0 : index
      %37 = vector.load %arg5[%c0_29, %c0_30] : memref<8x128xf32, #tpu.memory_space<vmem>>, vector<8x128xf32>
      %c0_31 = arith.constant 0 : index
      %c0_32 = arith.constant 0 : index
      %38 = vector.load %arg4[%c0_31, %c0_32] : memref<8x128xf32, #tpu.memory_space<vmem>>, vector<8x128xf32>
      %cst_33 = arith.constant dense<0.000000e+00> : vector<8x8xf32>
      %39 = tpu.matmul %37, %38, %cst_33 {dimension_numbers = #tpu.dot_dimension_numbers<[1], [1], [0], [0], [0, 0, 1, 0], [], []>} : vector<8x128xf32>, vector<8x128xf32>, vector<8x8xf32> -> vector<8x8xf32>
      %40 = arith.addf %36, %39 : vector<8x8xf32>
      %c0_34 = arith.constant 0 : index
      %c0_35 = arith.constant 0 : index
      %c0_36 = arith.constant 0 : index
      %41 = vector.load %arg7[%c0_34, %c0_35, %c0_36] : memref<1x8x8xf32, #tpu.memory_space<vmem>>, vector<1x8x8xf32>
      %42 = vector.shape_cast %41 : vector<1x8x8xf32> to vector<8x8xf32>
      %43 = vector.shape_cast %40 : vector<8x8xf32> to vector<1x8x8xf32>
      tpu.vector_store %arg7[%c0_34, %c0_35, %c0_36], %43 {strides = array<i32>} : memref<1x8x8xf32, #tpu.memory_space<vmem>>, vector<1x8x8xf32>,
    } else {
    }
    return
  }
  func.func @transform_0(%arg0: i32, %arg1: i32) -> (i32, i32) {
    %c1_i32 = arith.constant 1 : i32
    %0 = arith.muli %arg0, %c1_i32 : i32
    %1 = arith.addi %0, %arg1 : i32
    %c1_i32_0 = arith.constant 1 : i32
    %2 = arith.minsi %1, %c1_i32_0 : i32
    %c0_i32 = arith.constant 0 : i32
    %c0_i32_1 = arith.constant 0 : i32
    return %c0_i32, %2 : i32, i32
  }
  func.func @transform_1(%arg0: i32, %arg1: i32) -> (i32, i32) {
    %c1_i32 = arith.constant 1 : i32
    %0 = arith.muli %arg0, %c1_i32 : i32
    %1 = arith.addi %0, %arg1 : i32
    %c1_i32_0 = arith.constant 1 : i32
    %2 = arith.minsi %1, %c1_i32_0 : i32
    %c0_i32 = arith.constant 0 : i32
    %c0_i32_1 = arith.constant 0 : i32
    return %c0_i32, %2 : i32, i32
  }
  func.func @transform_2(%arg0: i32, %arg1: i32) -> (i32, i32) {
    %c1_i32 = arith.constant 1 : i32
    %0 = arith.muli %arg0, %c1_i32 : i32
    %1 = arith.addi %0, %arg1 : i32
    %c0_i32 = arith.constant 0 : i32
    %2 = arith.minsi %1, %c0_i32 : i32
    %c0_i32_0 = arith.constant 0 : i32
    %c0_i32_1 = arith.constant 0 : i32
    return %c0_i32_0, %2 : i32, i32
  }
  func.func @transform_3(%arg0: i32, %arg1: i32) -> (i32, i32) {
    %c1_i32 = arith.constant 1 : i32
    %0 = arith.muli %arg0, %c1_i32 : i32
    %1 = arith.addi %0, %arg1 : i32
    %c0_i32 = arith.constant 0 : i32
    %2 = arith.minsi %1, %c0_i32 : i32
    %c0_i32_0 = arith.constant 0 : i32
    %c0_i32_1 = arith.constant 0 : i32
    return %c0_i32_0, %2 : i32, i32
  }
  func.func @transform_4(%arg0: i32, %arg1: i32) -> (i32, i32, i32) {
    %c0_i32 = arith.constant 0 : i32
    %c0_i32_0 = arith.constant 0 : i32
    %c0_i32_1 = arith.constant 0 : i32
    return %arg0, %c0_i32, %c0_i32_0 : i32, i32, i32
  }
  func.func @transform_5(%arg0: i32, %arg1: i32) -> (i32, i32, i32) {
    %c0_i32 = arith.constant 0 : i32
    %c0_i32_0 = arith.constant 0 : i32
    %c0_i32_1 = arith.constant 0 : i32
    return %arg0, %c0_i32, %c0_i32_0 : i32, i32, i32
  }
  func.func @transform_6(%arg0: i32, %arg1: i32) -> (i32, i32, i32) {
    %c0_i32 = arith.constant 0 : i32
    %c0_i32_0 = arith.constant 0 : i32
    %c0_i32_1 = arith.constant 0 : i32
    return %arg0, %c0_i32, %c0_i32_0 : i32, i32, i32
  }
  func.func @transform_7(%arg0: i32, %arg1: i32) -> (i32, i32, i32) {
    %c0_i32 = arith.constant 0 : i32
    %c0_i32_0 = arith.constant 0 : i32
    %c0_i32_1 = arith.constant 0 : i32
    return %arg0, %c0_i32, %c0_i32_0 : i32, i32, i32
  }
}

</mosaic_0001>

<bundles_post_ra>
// kernel: bice_loss_pallas.1
= control target key start
LH: loop header
LB: loop body
LE: loop exit
PB: predicated region body
PF: predicated region fallthrough
CT: control target
= control target key end

     0   :  { %s2039_s0 = inlined_call_operand.hbm [shape: f32[8,256], index: 0, kind: input, shape index: {}]   ;;  %s2040_s1 = inlined_call_operand.hbm [shape: f32[8,256], index: 1, kind: input, shape index: {}]   ;;  %s2041_s2 = inlined_call_operand.hbm [shape: f32[8,128], index: 2, kind: input, shape index: {}]   ;;  %s2042_s3 = inlined_call_operand.hbm [shape: f32[8,128], index: 3, kind: input, shape index: {}]   ;;  %s2043_s4 = inlined_call_operand.hbm [shape: f32[2,8,8], index: 4, kind: output, shape index: {0}]   ;;  %s2044_s5 = inlined_call_operand.hbm [shape: f32[2,8,8], index: 5, kind: output, shape index: {1}]   ;;  %s2045_s6 = inlined_call_operand.hbm [shape: f32[2,8,1], index: 6, kind: output, shape index: {2}]   ;;  %s2046_s7 = inlined_call_operand.hbm [shape: f32[2,8,1], index: 7, kind: output, shape index: {3}]  }
   0x1   :  { %2062 = sst [smem:[#allocation31_spill]] %s2039_s0 }
   0x2   :  { %2063 = sst [smem:[#allocation32_spill]] %s2040_s1 }
   0x3   :  { %2064 = sst [smem:[#allocation33_spill]] %s2046_s7 }
   0x4   :  { %13 = vsyncpa [#allocation3], 0 }
   0x5   :  { %15 = vsyncpa [#allocation3 + $0x1], 0 }
   0x6   :  { %16 = vsyncpa [#allocation6], 0 }
   0x7   :  { %18 = vsyncpa [#allocation6 + $0x1], 0 }
   0x8   :  { %19 = vsyncpa [#allocation9], 0 }
   0x9   :  { %21 = vsyncpa [#allocation9 + $0x1], 0 }
   0xa   :  { %22 = vsyncpa [#allocation4], 0 }
   0xb   :  { %24 = vsyncpa [#allocation4 + $0x1], 0 }
   0xc   :  { %25 = vsyncpa [#allocation12], 0 }
   0xd   :  { %27 = vsyncpa [#allocation12 + $0x1], 0 }
   0xe   :  { %28 = vsyncpa [#allocation15], 0 }
   0xf   :  { %30 = vsyncpa [#allocation15 + $0x1], 0  ;;  %s1569_s24 = smov 0   ;;  %s1571_s25 = smov 0  }
  0x10   :  { %s1573_s26 = smov 0   ;;  %s1575_s27 = smov 0  }
  0x11   :  { %s1577_s28 = smov 0   ;;  %s1579_s29 = smov 0  }
  0x12   :  { %s1581_s30 = smov 0   ;;  %s1583_s8 = smov 0  }
  0x13   :  { %s1585_s9 = smov 0   ;;  %s1587_s10 = smov 0  }
  0x14   :  { %s1589_s11 = smov 0  }
  0x15 LB: > { %2065 = sst [smem:[#allocation23_spill]] %s1475_s24  ;;  %s1621_s12 = sadd.s32 4294967295, %s1515_s11   ;;  %s1515_s11 = sphi %s1589_s11, %s36_s11   ;;  %s1511_s10 = sphi %s1587_s10, %s2103_s10   ;;  %s1507_s9 = sphi %s1585_s9, %s2102_s9   ;;  %s1503_s8 = sphi %s1583_s8, %s2109_s8   ;;  %s1499_s30 = sphi %s1581_s30, %s2108_s30   ;;  %s1495_s29 = sphi %s1579_s29, %s2107_s29   ;;  %s1491_s28 = sphi %s1577_s28, %s2020_s28   ;;  %s1487_s27 = sphi %s1575_s27, %s2106_s27   ;;  %s1483_s26 = sphi %s1573_s26, %s2100_s26   ;;  %s1479_s25 = sphi %s1571_s25, %s2105_s25   ;;  %s1475_s24 = sphi %s1569_s24, %s2104_s24  }
  0x16   : > { %2066 = sst [smem:[#allocation24_spill]] %s1483_s26  ;;  %s2049_s13 = sadd.s32 4294967294, %s1515_s11  }
  0x17   : > { %2067 = sst [smem:[#allocation25_spill]] %s1511_s10  ;;  %s48_s14 = sadd.s32 1, %s1511_s10 }
  0x18   : > { %2068 = sst [smem:[#allocation26_spill]] %s1515_s11  ;;  %p53_p0 = scmp.lt.s32.totalorder %s1511_s10, 1 }
  0x19   : > { %p50_p1 = scmp.ge.s32.totalorder %s48_s14, 2  ;;  %s61_s15 = sadd.s32 1, %s1503_s8 }
  0x1a   : > { %s1628_s16 = scalar_select %p53_p0, %s1511_s10, 1 }
  0x1b   : > { %s2111_s14 = smov (%p50_p1, %s48_s14), 0  ;;  %p68_p2 = scmp.ne.s32.totalorder %s1503_s8, %s1499_s30 }
  0x1c   : > { %2069 = sst [smem:[#allocation27_spill]] %s2111_s14  ;;  %p69_p3 = scmp.eq.s32.totalorder %s1515_s11, 0 }
  0x1d   : > { %p56_p4 = scmp.lt.s32.totalorder %s2111_s14, 1  ;;  %p74_p5 = scmp.ne.s32.totalorder %s1499_s30, %s1495_s29 }
  0x1e   : > { %p1637_p6 = por %p69_p3, %p68_p2  ;;  %p75_p7 = scmp.eq.s32.totalorder %s1621_s12, 0 }
  0x1f   : > { %s57_s18 = scalar_select %p56_p4, %s2111_s14, 1 }
  0x20   : > { %p1643_p8 = por %p75_p7, %p74_p5  ;;  %p1472_p9 = scmp.ne.s32.totalorder %s1491_s28, 0 }
  0x21   : > { %s58_s20 = ssub.s32 %s1628_s16, %s57_s18  ;;  %p138_p10 = scmp.ne.s32.totalorder %s1491_s28, %s1487_s27 }
  0x22   : > { %s2071_s19 = scalar_select %p1643_p8, 1, 0 }
  0x23   : > { %p59_p11 = scmp.eq.s32.totalorder %s58_s20, 0  ;;  %p1650_p12 = por %p1472_p9, %p69_p3 }
  0x24   : > { %p1654_p13 = por %p138_p10, %p75_p7  ;;  %s180_s23 = ssub.s32 %s1511_s10, %s2111_s14 }
  0x25   : > { %s1661_s29 = scalar_select %p59_p11, %s1503_s8, %s61_s15  }
  0x26   : > { %s2073_s22 = scalar_select %p1654_p13, 1, 0 }
  0x27   : > { %2074 = sst [smem:[#allocation28_spill]] %s1661_s29  ;;  %p181_p0 = scmp.eq.s32.totalorder %s180_s23, 0 }
  0x28   : > { %s183_s27 = sadd.s32 1, %s1483_s26  ;;  %p193_p1 = scmp.ne.s32.totalorder %s1483_s26, %s1479_s25 }
  0x29   : > { %p194_p2 = scmp.eq.s32.totalorder %s1621_s12, 1  ;;  %p199_p4 = scmp.ne.s32.totalorder %s1479_s25, %s1475_s24 }
  0x2a   : > { %s1668_s18 = scalar_select %p181_p0, %s1483_s26, %s183_s27  }
  0x2b   : > { %p1670_p3 = por %p194_p2, %p193_p1  ;;  %p200_p5 = scmp.eq.s32.totalorder %s2049_s13, 1 }
  0x2c   : > { %2075 = sst [smem:[#allocation29_spill]] %s1668_s18  ;;  %p1062_p9 = scmp.lt.s32.totalorder %s1515_s11, 2 }
  0x2d   : > { %s2076_s20 = scalar_select %p1670_p3, 1, 0 }
  0x2e   : > { %s2051_s15 = sand.u32 1, %s1503_s8   ;;  %p1681_p10 = por %p200_p5, %p199_p4 }
  0x2f   : > { %s1687_s23 = sshll.u32 %s2051_s15, 3  ;;  %s2055_s27 = sshll.u32 %s1628_s16, 7 }
  0x30   : > { %s2077_s14 = scalar_select %p1681_p10, 1, 0 }
  0x31   : > { %p1692_p11 = pnand %p1062_p9, %p1637_p6  ;;  %s319_s13 = sand.u32 1, %s1515_s11  }
  0x32   : > { %2078 = sst [smem:[#allocation30_spill]] %s2077_s14  ;;  %s2080_s1 = sld [smem:[#allocation32_spill]] }
  0x33   : > { %s323_s15 = scalar_lea.vmem [#allocation5], %s1687_s23  ;;  %p1709_p6 = pnand %p1062_p9, %p1650_p12 }
  0x34   : > { %s333_s14 = sshll.u32 %s323_s15, 4  ;;  %s1713_s24 = scalar_lea.sflag [#allocation6], %s319_s13  ;;  %s1705_s14 = int_to_ptr.vmem [resolvable:$true] %s333_s14 }
  0x35   : > { %s2081_s17 = scalar_select %p1709_p6, 1, 0 }
  0x36   : > { %p1166_p1 = pneg %p1692_p11 }
  0x38   : > { %s1702_s26 = scalar_lea.hbm %s2080_s1, %s2055_s27  ;;  %s1169_s15 = scalar_lea.hbm %s2080_s1, 256 }
  0x39   : > { %s1164_s7 = scalar_lea.hbm %s1702_s26, 128  ;;  %p1170_p12 = scmp.lt.u32.totalorder %s1702_s26, %s2080_s1 }
  0x3a   : > { %p1165_p0 = scmp.ne.s32.totalorder %s1702_s26, %s1164_s7  ;;  %p1171_p5 = scmp.lt.u32.totalorder %s1169_s15, %s1164_s7 }
  0x3b   : > { %p1173_p7 = scmp.lt.u32.totalorder %s1164_s7, %s1702_s26 }
  0x3c   : > { %p1167_p2 = pnand %p1166_p1, %p1165_p0  ;;  %p1172_p9 = por %p1171_p5, %p1170_p12 }
  0x3e   : > { %p1168_p4 = pneg %p1167_p2  ;;  %p1174_p10 = por %p1173_p7, %p1172_p9 }
  0x40   : > { %p1175_p3 = pnand %p1174_p10, %p1168_p4 }
  0x42   : > { %1178 = shalt.err (!%p1175_p3)
}
  0x43   : > { %s1179_s13 = scalar_lea.vmem %s1705_s14, 128  ;;  %s1517_s29 = smov [#allocation5]  }
  0x44   : > { %p1180_p0 = scmp.ne.s32.totalorder %s1705_s14, %s1179_s13  ;;  %s1184_s18 = sshll.u32 %s1517_s29, 4  ;;  %s1185_s18 = int_to_ptr.vmem [resolvable:$false] %s1184_s18 }
  0x45   : > { %s1186_s27 = scalar_lea.vmem %s1185_s18, 256  ;;  %p1187_p8 = scmp.lt.s32.totalorder %s1705_s14, %s1185_s18 }
  0x46   : > { %p1182_p2 = pnand %p1180_p0, %p1166_p1  ;;  %p1188_p12 = scmp.lt.s32.totalorder %s1186_s27, %s1179_s13 }
  0x48   : > { %p1183_p13 = pneg %p1182_p2  ;;  %p1189_p5 = por %p1188_p12, %p1187_p8 }
  0x4a   : > { %p1190_p7 = pnand %p1189_p5, %p1183_p13 }
  0x4c   : > { %1193 = shalt.err (!%p1190_p7)
}
  0x4d   : > { %1042 = dma.hbm_to_vmem [thread:$0]  (!%p1692_p11), %s1702_s26, 128, %s1705_s14, %s1713_s24  }
  0x4e   : > { %p986_p3 = scmp.ge.s32.totalorder %s1515_s11, 1  ;;  %p380_p10 = scmp.lt.s32.totalorder %s1515_s11, 3 }
  0x4f   : > { %s2083_s15 = sshll.u32 %s1628_s16, 7  ;;  %s2084_s0 = sld [smem:[#allocation31_spill]] }
  0x50   : > { %p1743_p4 = pnand %p986_p3, %p380_p10  ;;  %s302_s18 = scalar_lea.vmem [#allocation2], %s1687_s23 }
  0x51   : > { %s312_s27 = sshll.u32 %s302_s18, 4  ;;  %s2085_s26 = sand.u32 1, %s1503_s8   ;;  %s313_s27 = int_to_ptr.vmem [resolvable:$true] %s312_s27 }
  0x52   : > { %s2082_s7 = scalar_select %p1743_p4, 1, 0 }
  0x53   : > { %s299_s14 = scalar_lea.sflag [#allocation3], %s2085_s26 }
  0x55   : > { %s1752_s29 = scalar_lea.hbm %s2084_s0, %s2083_s15  ;;  %s1199_s15 = scalar_lea.hbm %s2084_s0, 256 }
  0x56   : > { %s1194_s1 = scalar_lea.hbm %s1752_s29, 128  ;;  %p1200_p0 = scmp.lt.u32.totalorder %s1752_s29, %s2084_s0 }
  0x57   : > { %p1195_p8 = scmp.ne.s32.totalorder %s1752_s29, %s1194_s1  ;;  %p1201_p2 = scmp.lt.u32.totalorder %s1199_s15, %s1194_s1 }
  0x58   : > { %p1203_p5 = scmp.lt.u32.totalorder %s1194_s1, %s1752_s29 }
  0x59   : > { %p1197_p13 = pnand %p1195_p8, %p1166_p1  ;;  %p1202_p12 = por %p1201_p2, %p1200_p0 }
  0x5b   : > { %p1198_p9 = pneg %p1197_p13  ;;  %p1204_p7 = por %p1203_p5, %p1202_p12 }
  0x5d   : > { %p1205_p3 = pnand %p1204_p7, %p1198_p9 }
  0x5f   : > { %1208 = shalt.err (!%p1205_p3)
}
  0x60   : > { %s1209_s23 = scalar_lea.vmem %s313_s27, 128  ;;  %s1518_s18 = smov [#allocation2]  }
  0x61   : > { %p1210_p10 = scmp.ne.s32.totalorder %s313_s27, %s1209_s23  ;;  %s1214_s11 = sshll.u32 %s1518_s18, 4  ;;  %s1215_s11 = int_to_ptr.vmem [resolvable:$false] %s1214_s11 }
  0x62   : > { %s1216_s26 = scalar_lea.vmem %s1215_s11, 256  ;;  %p1217_p4 = scmp.lt.s32.totalorder %s313_s27, %s1215_s11 }
  0x63   : > { %p1212_p8 = pnand %p1210_p10, %p1166_p1  ;;  %p1218_p6 = scmp.lt.s32.totalorder %s1216_s26, %s1209_s23 }
  0x65   : > { %p1213_p13 = pneg %p1212_p8  ;;  %p1219_p0 = por %p1218_p6, %p1217_p4 }
  0x67   : > { %p1220_p2 = pnand %p1219_p0, %p1213_p13 }
  0x69   : > { %1223 = shalt.err (!%p1220_p2)
}
  0x6a   : > { %1039 = dma.hbm_to_vmem [thread:$0]  (!%p1692_p11), %s1752_s29, 128, %s313_s27, %s299_s14  }
  0x6b   : > { %s1519_s1 = smov [#allocation7]   ;;  %s1224_s13 = scalar_lea.hbm %s2041_s2, 128 }
  0x6c   : > { %s354_s16 = sshll.u32 %s1519_s1, 4  ;;  %p1225_p1 = scmp.ne.s32.totalorder %s2041_s2, %s1224_s13  ;;  %s355_s16 = int_to_ptr.vmem [resolvable:$true] %s354_s16 }
  0x6d   : > { %p2086_p6 = scmp.ne.s32.totalorder %s2081_s17, 0  ;;  %p1231_p5 = scmp.lt.u32.totalorder %s1224_s13, %s1224_s13 }
  0x6e   : > { %p1233_p11 = scmp.lt.u32.totalorder %s1224_s13, %s2041_s2 }
  0x6f   : > { %p1226_p4 = pneg %p2086_p6 }
  0x70   : > { %p1234_p7 = por %p1233_p11, %p1231_p5 }
  0x71   : > { %p1227_p9 = pnand %p1226_p4, %p1225_p1 }
  0x73   : > { %p1228_p12 = pneg %p1227_p9 }
  0x75   : > { %p1235_p3 = pnand %p1234_p7, %p1228_p12 }
  0x77   : > { %1238 = shalt.err (!%p1235_p3)
}
  0x78   : > { %s1239_s27 = scalar_lea.vmem %s355_s16, 128  ;;  %s1246_s0 = scalar_lea.vmem %s355_s16, 256 }
  0x79   : > { %p1240_p10 = scmp.ne.s32.totalorder %s355_s16, %s1239_s27  ;;  %p1247_p0 = scmp.lt.s32.totalorder %s355_s16, %s355_s16 }
  0x7a   : > { %p1248_p2 = scmp.lt.s32.totalorder %s1246_s0, %s1239_s27 }
  0x7b   : > { %p1242_p8 = pnand %p1240_p10, %p1226_p4 }
  0x7c   : > { %p1249_p1 = por %p1248_p2, %p1247_p0 }
  0x7d   : > { %p1243_p13 = pneg %p1242_p8 }
  0x7f   : > { %p1250_p9 = pnand %p1249_p1, %p1243_p13 }
  0x81   : > { %1253 = shalt.err (!%p1250_p9)
}
  0x82   : > { %1045 = dma.hbm_to_vmem [thread:$0]  (!%p2086_p6), %s2041_s2, 128, %s355_s16, %s1713_s24  }
  0x83   : > { %s1520_s11 = smov [#allocation8]   ;;  %s1254_s21 = scalar_lea.hbm %s2042_s3, 128 }
  0x84   : > { %s375_s26 = sshll.u32 %s1520_s11, 4  ;;  %p1255_p12 = scmp.ne.s32.totalorder %s2042_s3, %s1254_s21  ;;  %s376_s26 = int_to_ptr.vmem [resolvable:$true] %s375_s26 }
  0x85   : > { %p1261_p7 = scmp.lt.u32.totalorder %s1254_s21, %s1254_s21  ;;  %p1263_p3 = scmp.lt.u32.totalorder %s1254_s21, %s2042_s3 }
  0x86   : > { %p1257_p5 = pnand %p1255_p12, %p1226_p4 }
  0x87   : > { %p1264_p10 = por %p1263_p3, %p1261_p7 }
  0x88   : > { %p1258_p11 = pneg %p1257_p5 }
  0x8a   : > { %p1265_p8 = pnand %p1264_p10, %p1258_p11 }
  0x8c   : > { %1268 = shalt.err (!%p1265_p8)
}
  0x8d   : > { %s1269_s24 = scalar_lea.vmem %s376_s26, 128  ;;  %s1276_s16 = scalar_lea.vmem %s376_s26, 256 }
  0x8e   : > { %p1270_p13 = scmp.ne.s32.totalorder %s376_s26, %s1269_s24  ;;  %p1277_p1 = scmp.lt.s32.totalorder %s376_s26, %s376_s26 }
  0x8f   : > { %p1278_p9 = scmp.lt.s32.totalorder %s1276_s16, %s1269_s24 }
  0x90   : > { %p1272_p0 = pnand %p1270_p13, %p1226_p4 }
  0x91   : > { %p1279_p12 = por %p1278_p9, %p1277_p1 }
  0x92   : > { %p1273_p2 = pneg %p1272_p0 }
  0x94   : > { %p1280_p5 = pnand %p1279_p12, %p1273_p2 }
  0x96   : > { %1283 = shalt.err (!%p1280_p5)
}
  0x97   : > { %1048 = dma.hbm_to_vmem [thread:$0]  (!%p2086_p6), %s2042_s3, 128, %s376_s26, [#allocation9]  }
  0x98   : > { %p2087_p11 = scmp.ne.s32.totalorder %s2082_s7, 0 }
  0x99   : > { %s386_s14 = sand.u32 (!%p2087_p11), 1, %s1499_s30   ;;  %p2088_p4 = scmp.ne.s32.totalorder (!%p2087_p11), %s2071_s19, 0 }
  0x9a   : > { %384 = sbr.rel (%p2087_p11) target bundleno = 699 (0x2bb), region = 36  ;;  %s1822_s23 = sshll.u32 (!%p2087_p11), %s386_s14, 3 }
  0x9b   : > { %s387_s11 = scalar_lea.sflag (!%p2087_p11), [#allocation3], %s386_s14  ;;  %s390_s1 = scalar_lea.vmem (!%p2087_p11), [#allocation2], %s1822_s23 }
  0xa1   : > { %1445 = dma.done.wait (%p2088_p4), %s387_s11, 128  }
  0xa2   : > { %1447 = vsyncadd (%p2088_p4), %s387_s11, 4294967168  ;;  %s395_s17 = sand.u32 1, %s1621_s12   ;;  %s399_s26 = scalar_lea.vmem [#allocation5], %s1822_s23 }
  0xa3   : > { %s396_s7 = scalar_lea.sflag [#allocation6], %s395_s17 }
  0xa4   : > { %1449 = dma.done.wait (%p2088_p4), %s396_s7, 128  }
  0xa5   : > { %1451 = vsyncadd (%p2088_p4), %s396_s7, 4294967168  ;;  %s406_s15 = sand.u32 1, %s1491_s28   ;;  %p2089_p6 = scmp.ne.s32.totalorder %s2073_s22, 0 }
  0xa6   : > { %s1838_s21 = sshll.u32 %s406_s15, 3 }
  0xa7   : > { %s408_s13 = scalar_lea.vmem [#allocation7], %s1838_s21 }
  0xa8   : > { %1453 = dma.done.wait (%p2089_p6), %s396_s7, 128  }
  0xa9   : > { %1455 = vsyncadd (%p2089_p6), %s396_s7, 4294967168  ;;  %s414_s18 = scalar_lea.sflag [#allocation9], %s406_s15  ;;  %s417_s10 = scalar_lea.vmem [#allocation8], %s1838_s21 }
  0xaa   : > { %1457 = dma.done.wait (%p2089_p6), %s414_s18, 128  }
  0xab   : > { %1459 = vsyncadd (%p2089_p6), %s414_s18, 4294967168  ;;  %s1851_s19 = sand.u32 1, %s1479_s25   ;;  %vm498_vm0 = vcmask 7168   ;;  %v1521_v0 = vmov 0.0   ;;  %vm1522_vm1 = vmmov 0   ;;  %v501_v1 = vld [vmem:[%s390_s1] sm:$0xff] }
  0xac   : > { %1010 = vmatprep.subr.mxu0 %v1521_v0  ;;  %1012 = vmatprep.mubr.msk.f32.mxu0 %vm1522_vm1, %v1521_v0  ;;  %s991_s29 = sshll.u32 %s1851_s19, 3  ;;  %v502_v2 = vld [vmem:[%s399_s26] sm:$0xff]  ;;  %v578_v3 = vand.u32 2147483647, %v501_v1  ;;  %vm495_vm2 = vcmask 64512   ;;  %p995_p7 = scmp.ge.s32.totalorder %s1507_s9, 1 }
  0xad   : > { %s1854_s24 = scalar_lea.vmem [#allocation13], %s991_s29  ;;  %1011 = vmatpush3.xpose.msra.mxu0 %v501_v1  ;;  %v585_v4 = vand.u32 2147483647, %v502_v2  ;;  %s1858_s22 = scalar_lea.vmem [#allocation14], %s991_s29  ;;  %v596_v15 = vld [vmem:[%s408_s13] sm:$0xff] (!%p995_p7)  ;;  %v1523_v16 = vmov (!%p995_p7), 0.0  }
  0xae   : > { %499 = vst.msk [vmem:[%s1854_s24] sm:$0xff] %vm498_vm0, %v1521_v0  ;;  %579 = vadd.xlane.f32.xlu0 %v578_v3  ;;  %500 = vst.msk [vmem:[%s1858_s22] sm:$0xff] %vm498_vm0, %v1521_v0  ;;  %s1862_s16 = scalar_lea.vmem [#allocation10], %s991_s29  ;;  %s1866_s27 = scalar_lea.vmem [#allocation11], %s991_s29  ;;  %1015 = vmatprep.subr.mxu0 (!%p995_p7), %v1523_v16  ;;  %vm1524_vm3 = vmmov (!%p995_p7), 0   ;;  %v595_v17 = vld [vmem:[%s417_s10] sm:$0xff] (!%p995_p7) }
  0xaf   : > { %496 = vst.msk [vmem:[%s1862_s16] sm:$0xff] %vm495_vm2, %v1521_v0  ;;  %497 = vst.msk [vmem:[%s1866_s27] sm:$0xff] %vm495_vm2, %v1521_v0 }
  0xb0   : > { %1013 = vmatmul.mubr.f32.vlgmr.msra.gmra.mrb[0].mxu0 %v502_v2 }
  0xb1   : > { %1017 = vmatprep.mubr.msk.f32.mxu0 (!%p995_p7), %vm1524_vm3, %v1523_v16  ;;  %1016 = vmatpush3.xpose.msra.mxu0 (!%p995_p7), %v596_v15 }
  0xb2   : > { %586 = vadd.xlane.f32.xlu0 %v585_v4 }
  0xb5   : > { %v577_v5 = vld [vmem:[%s1854_s24] sm:$0xff]  ;;  %v584_v8 = vld [vmem:[%s1858_s22] sm:$0xff] }
  0xb6   : > { %v503_v11 = vld [vmem:[%s1862_s16] sm:$0xff]  ;;  %v594_v18 = vld [vmem:[%s1866_s27] sm:$0xff] (!%p995_p7) }
 0x13b   : > { %v580_v6 = vpop.xlane.xlu0 %579 }
 0x13c   : > { %v581_v7 = vadd.f32 %v580_v6, %v577_v5 }
 0x13e   : > { %583 = vst.msk [vmem:[%s1854_s24] sm:$0xff] %vm498_vm0, %v581_v7 }
 0x13f   : > { %v587_v9 = vpop.xlane.xlu0 %586 }
 0x140   : > { %v588_v10 = vadd.f32 %v587_v9, %v584_v8 }
 0x142   : > { %589 = vst.msk [vmem:[%s1858_s22] sm:$0xff] %vm498_vm0, %v588_v10 }
 0x180   : > { %593 = sbr.rel (%p995_p7) target bundleno = 603 (0x25b), region = 60 }
 0x183   : > { %v570_v12 = vpop.f32.mrb[0].mxu0 }
 0x184   : > { %v574_v13 = vadd.f32 %v570_v12, %v503_v11  ;;  %v1014_v14 = vpop.f32.mrb[1].mxu0  ;;  %1018 = vmatmul.mubr.f32.vlgmr.msra.gmra.mrb[0].mxu0 (!%p995_p7), %v595_v17 }
 0x186   : > { %576 = vst.msk [vmem:[%s1862_s16] sm:$0xff] %vm495_vm2, %v574_v13 }
 0x257   : > { %v663_v19 = vpop.f32.mrb[0].mxu0 }
 0x258   : > { %v667_v20 = vadd.f32 %v663_v19, %v594_v18  ;;  %v1019_v21 = vpop.f32.mrb[1].mxu0 }
 0x25a   : > { %668 = vst.msk [vmem:[%s1866_s27] sm:$0xff] %vm495_vm2, %v667_v20 }
 0x25b PF: > { %s1888_s0 = sshll.u32 %s1507_s9, 7  ;;  %s711_s1 = sshll.u32 %s1866_s27, 4  ;;  %s712_s1 = int_to_ptr.vmem [resolvable:$true] %s711_s1 }
 0x25c   : > { %s1894_s11 = scalar_lea.hbm %s2044_s5, %s1888_s0  ;;  %s1899_s7 = scalar_lea.sflag [#allocation12], %s395_s17 }
 0x25d   : > { %s1284_s26 = scalar_lea.vmem %s712_s1, 128  ;;  %p2090_p10 = scmp.ne.s32.totalorder %s2076_s20, 0 }
 0x25e   : > { %p1285_p3 = scmp.ne.s32.totalorder %s712_s1, %s1284_s26  ;;  %s1525_s15 = smov [#allocation11]  }
 0x25f   : > { %s1288_s21 = sshll.u32 %s1525_s15, 4  ;;  %s1289_s21 = int_to_ptr.vmem [resolvable:$false] %s1288_s21 }
 0x260   : > { %p1286_p8 = pnand %p1285_p3, %p2090_p10  ;;  %s1290_s9 = scalar_lea.vmem %s1289_s21, 256 }
 0x261   : > { %p1291_p0 = scmp.lt.s32.totalorder %s712_s1, %s1289_s21  ;;  %p1292_p2 = scmp.lt.s32.totalorder %s1290_s9, %s1284_s26 }
 0x262   : > { %p1287_p13 = pneg %p1286_p8 }
 0x263   : > { %p1293_p1 = por %p1292_p2, %p1291_p0 }
 0x265   : > { %p1294_p9 = pnand %p1293_p1, %p1287_p13 }
 0x267   : > { %1297 = shalt.err (!%p1294_p9)
}
 0x268   : > { %s1298_s12 = scalar_lea.hbm %s1894_s11, 128  ;;  %s1302_s18 = scalar_lea.hbm %s2044_s5, 256 }
 0x269   : > { %p1299_p12 = scmp.ne.s32.totalorder %s1894_s11, %s1298_s12  ;;  %p1303_p4 = scmp.lt.u32.totalorder %s1894_s11, %s2044_s5 }
 0x26a   : > { %p1304_p6 = scmp.lt.u32.totalorder %s1302_s18, %s1298_s12  ;;  %p1306_p3 = scmp.lt.u32.totalorder %s1298_s12, %s1894_s11 }
 0x26b   : > { %p1300_p5 = pnand %p1299_p12, %p2090_p10 }
 0x26c   : > { %p1305_p7 = por %p1304_p6, %p1303_p4 }
 0x26d   : > { %p1301_p11 = pneg %p1300_p5 }
 0x26e   : > { %p1307_p8 = por %p1306_p3, %p1305_p7 }
 0x270   : > { %p1308_p13 = pnand %p1307_p8, %p1301_p11 }
 0x272   : > { %1311 = shalt.err (!%p1308_p13)
}
 0x273   : > { %1029 = dma.vmem_to_hbm [thread:$0]  (%p2090_p10), %s712_s1, 128, %s1894_s11, %s1899_s7  }
 0x274   : > { %s1923_s23 = scalar_lea.hbm %s2043_s4, %s1888_s0  ;;  %s698_s26 = sshll.u32 %s1862_s16, 4  ;;  %s1926_s26 = int_to_ptr.vmem [resolvable:$true] %s698_s26 }
 0x275   : > { %s1932_s9 = scalar_lea.hbm %s2045_s6, %s1888_s0  ;;  %s670_s12 = scalar_lea.sflag [#allocation4], %s1851_s19 }
 0x276   : > { %s1312_s17 = scalar_lea.vmem %s1926_s26, 128  ;;  %s1526_s11 = smov [#allocation10]  }
 0x277   : > { %p1313_p0 = scmp.ne.s32.totalorder %s1926_s26, %s1312_s17  ;;  %s1316_s1 = sshll.u32 %s1526_s11, 4  ;;  %s1317_s1 = int_to_ptr.vmem [resolvable:$false] %s1316_s1 }
 0x278   : > { %s1318_s16 = scalar_lea.vmem %s1317_s1, 256  ;;  %p1319_p9 = scmp.lt.s32.totalorder %s1926_s26, %s1317_s1 }
 0x279   : > { %p1314_p2 = pnand %p1313_p0, %p2090_p10  ;;  %p1320_p12 = scmp.lt.s32.totalorder %s1318_s16, %s1312_s17 }
 0x27b   : > { %p1315_p1 = pneg %p1314_p2  ;;  %p1321_p5 = por %p1320_p12, %p1319_p9 }
 0x27d   : > { %p1322_p11 = pnand %p1321_p5, %p1315_p1 }
 0x27f   : > { %1325 = shalt.err (!%p1322_p11)
}
 0x280   : > { %s1326_s13 = scalar_lea.hbm %s1923_s23, 128  ;;  %s1330_s29 = scalar_lea.hbm %s2043_s4, 256 }
 0x281   : > { %p1327_p4 = scmp.ne.s32.totalorder %s1923_s23, %s1326_s13  ;;  %p1331_p3 = scmp.lt.u32.totalorder %s1923_s23, %s2043_s4 }
 0x282   : > { %p1332_p8 = scmp.lt.u32.totalorder %s1330_s29, %s1326_s13  ;;  %p1334_p0 = scmp.lt.u32.totalorder %s1326_s13, %s1923_s23 }
 0x283   : > { %p1328_p6 = pnand %p1327_p4, %p2090_p10 }
 0x284   : > { %p1333_p13 = por %p1332_p8, %p1331_p3 }
 0x285   : > { %p1329_p7 = pneg %p1328_p6 }
 0x286   : > { %p1335_p2 = por %p1334_p0, %p1333_p13 }
 0x288   : > { %p1336_p1 = pnand %p1335_p2, %p1329_p7 }
 0x28a   : > { %1339 = shalt.err (!%p1336_p1)
}
 0x28b   : > { %1028 = dma.vmem_to_hbm [thread:$0]  (%p2090_p10), %s1926_s26, 128, %s1923_s23, %s670_s12  }
 0x28c   : > { %s724_s15 = sshll.u32 %s1854_s24, 4  ;;  %s2091_s11 = sld [smem:[#allocation33_spill]]  ;;  %s725_s15 = int_to_ptr.vmem [resolvable:$true] %s724_s15 }
 0x28d   : > { %s1340_s18 = scalar_lea.vmem %s725_s15, 128  ;;  %s1527_s13 = smov [#allocation13]  }
 0x28e   : > { %p1341_p9 = scmp.ne.s32.totalorder %s725_s15, %s1340_s18  ;;  %s1344_s10 = sshll.u32 %s1527_s13, 4  ;;  %s1345_s10 = int_to_ptr.vmem [resolvable:$false] %s1344_s10 }
 0x28f   : > { %s1346_s29 = scalar_lea.vmem %s1345_s10, 256  ;;  %p1347_p11 = scmp.lt.s32.totalorder %s725_s15, %s1345_s10 }
 0x290   : > { %p1342_p12 = pnand %p1341_p9, %p2090_p10  ;;  %p1348_p4 = scmp.lt.s32.totalorder %s1346_s29, %s1340_s18 }
 0x292   : > { %s2092_s1 = smov %s2091_s11  ;;  %s1961_s16 = scalar_lea.hbm %s2091_s11, %s1888_s0 }
 0x293   : > { %p1343_p5 = pneg %p1342_p12  ;;  %p1349_p6 = por %p1348_p4, %p1347_p11 }
 0x295   : > { %p1350_p7 = pnand %p1349_p6, %p1343_p5 }
 0x297   : > { %1353 = shalt.err (!%p1350_p7)
}
 0x298   : > { %s1354_s24 = scalar_lea.hbm %s1932_s9, 128  ;;  %s1358_s26 = scalar_lea.hbm %s2045_s6, 256 }
 0x299   : > { %p1355_p3 = scmp.ne.s32.totalorder %s1932_s9, %s1354_s24  ;;  %p1359_p0 = scmp.lt.u32.totalorder %s1932_s9, %s2045_s6 }
 0x29a   : > { %p1360_p2 = scmp.lt.u32.totalorder %s1358_s26, %s1354_s24  ;;  %p1362_p9 = scmp.lt.u32.totalorder %s1354_s24, %s1932_s9 }
 0x29b   : > { %p1356_p8 = pnand %p1355_p3, %p2090_p10 }
 0x29c   : > { %p1361_p1 = por %p1360_p2, %p1359_p0 }
 0x29d   : > { %p1357_p13 = pneg %p1356_p8 }
 0x29e   : > { %p1363_p12 = por %p1362_p9, %p1361_p1 }
 0x2a0   : > { %p1364_p5 = pnand %p1363_p12, %p1357_p13 }
 0x2a2   : > { %1367 = shalt.err (!%p1364_p5)
}
 0x2a3   : > { %1030 = dma.vmem_to_hbm [thread:$0]  (%p2090_p10), %s725_s15, 128, %s1932_s9, %s1899_s7  }
 0x2a4   : > { %s737_s14 = sshll.u32 %s1858_s22, 4  ;;  %s685_s21 = scalar_lea.sflag [#allocation15], %s1851_s19  ;;  %s738_s14 = int_to_ptr.vmem [resolvable:$true] %s737_s14 }
 0x2a5   : > { %s1368_s17 = scalar_lea.vmem %s738_s14, 128  ;;  %s1528_s11 = smov [#allocation14]  }
 0x2a6   : > { %p1369_p11 = scmp.ne.s32.totalorder %s738_s14, %s1368_s17  ;;  %s1372_s18 = sshll.u32 %s1528_s11, 4  ;;  %s1373_s18 = int_to_ptr.vmem [resolvable:$false] %s1372_s18 }
 0x2a7   : > { %s1374_s13 = scalar_lea.vmem %s1373_s18, 256  ;;  %p1375_p7 = scmp.lt.s32.totalorder %s738_s14, %s1373_s18 }
 0x2a8   : > { %p1370_p4 = pnand %p1369_p11, %p2090_p10  ;;  %p1376_p3 = scmp.lt.s32.totalorder %s1374_s13, %s1368_s17 }
 0x2aa   : > { %p1371_p6 = pneg %p1370_p4  ;;  %p1377_p8 = por %p1376_p3, %p1375_p7 }
 0x2ac   : > { %p1378_p13 = pnand %p1377_p8, %p1371_p6 }
 0x2ae   : > { %1381 = shalt.err (!%p1378_p13)
}
 0x2af   : > { %s1382_s19 = scalar_lea.hbm %s1961_s16, 128  ;;  %s1386_s9 = scalar_lea.hbm %s2092_s1, 256 }
 0x2b0   : > { %p1383_p0 = scmp.ne.s32.totalorder %s1961_s16, %s1382_s19  ;;  %p1387_p9 = scmp.lt.u32.totalorder %s1961_s16, %s2092_s1 }
 0x2b1   : > { %p1388_p12 = scmp.lt.u32.totalorder %s1386_s9, %s1382_s19  ;;  %p1390_p11 = scmp.lt.u32.totalorder %s1382_s19, %s1961_s16 }
 0x2b2   : > { %p1384_p2 = pnand %p1383_p0, %p2090_p10 }
 0x2b3   : > { %p1389_p5 = por %p1388_p12, %p1387_p9 }
 0x2b4   : > { %p1385_p1 = pneg %p1384_p2 }
 0x2b5   : > { %p1391_p4 = por %p1390_p11, %p1389_p5 }
 0x2b7   : > { %p1392_p6 = pnand %p1391_p4, %p1385_p1 }
 0x2b9   : > { %1395 = shalt.err (!%p1392_p6)
}
 0x2ba   : > { %1031 = dma.vmem_to_hbm [thread:$0]  (%p2090_p10), %s738_s14, 128, %s1961_s16, %s685_s21  }
 0x2bb PF: > { %s2093_s29 = sld [smem:[#allocation23_spill]]  ;;  %s2094_s24 = sld [smem:[#allocation30_spill]] }
 0x2bc   : > { %s2095_s0 = sld [smem:[#allocation26_spill]] }
 0x2c1   : > { %s749_s23 = sand.u32 1, %s2093_s29   ;;  %p2096_p7 = scmp.ne.s32.totalorder %s2094_s24, 0 }
 0x2c2   : > { %p2097_p3 = scmp.ge.s32.totalorder %s2095_s0, 2  ;;  %s750_s26 = scalar_lea.sflag [#allocation4], %s749_s23 }
 0x2c4   : > { %p1050_p8 = pnand %p2097_p3, %p2096_p7 }
 0x2c6   : > { %1461 = dma.done.wait (!%p1050_p8), %s750_s26, 128  }
 0x2c7   : > { %1463 = vsyncadd (!%p1050_p8), %s750_s26, 4294967168  ;;  %s2098_s12 = sadd.s32 4294967294, %s2095_s0  }
 0x2c8   : > { %s758_s27 = sand.u32 1, %s2098_s12  }
 0x2c9   : > { %s759_s17 = scalar_lea.sflag [#allocation12], %s758_s27 }
 0x2ca   : > { %1465 = dma.done.wait (!%p1050_p8), %s759_s17, 256  }
 0x2cb   : > { %1467 = vsyncadd (!%p1050_p8), %s759_s17, 4294967040  ;;  %s777_s20 = scalar_lea.sflag [#allocation15], %s749_s23 }
 0x2cc   : > { %1469 = dma.done.wait (!%p1050_p8), %s777_s20, 128  }
 0x2cd   : > { %1471 = vsyncadd (!%p1050_p8), %s777_s20, 4294967168  ;;  %s36_s11 = sadd.s32 1, %s2095_s0   ;;  %s2099_s16 = sld [smem:[#allocation24_spill]] }
 0x2ce   : > { %p33_p10 = scmp.ge.s32.totalorder %s36_s11, 4   ;;  %s2100_s26 = sld [smem:[#allocation29_spill]] }
 0x2cf   : > { %s2101_s14 = sld [smem:[#allocation28_spill]]  ;;  %s2102_s9 = sld [smem:[#allocation25_spill]] }
 0x2d0   : > { %s2103_s10 = sld [smem:[#allocation27_spill]]  ;;  %s2104_s24 = smov %s1479_s25 }
 0x2d1   : > { %s2106_s27 = smov %s1491_s28  ;;  %s2020_s28 = smov 0  }
 0x2d2   : > { %s2107_s29 = smov %s1499_s30  ;;  %s2108_s30 = smov %s1503_s8 }
 0x2d3   : > { %s2105_s25 = smov %s2099_s16  ;;  %35 = sbr.rel (!%p33_p10) target bundleno = 21 (0x15), region = 175 }
 0x2d5   : > { %s2109_s8 = smov %s2101_s14 }
 0x2da   :  { %782 = vsyncpa [#allocation3], 1 }
 0x2db   :  { %784 = vsyncpa [#allocation3 + $0x1], 1 }
 0x2dc   :  { %785 = vsyncpa [#allocation6], 1 }
 0x2dd   :  { %787 = vsyncpa [#allocation6 + $0x1], 1 }
 0x2de   :  { %788 = vsyncpa [#allocation9], 1 }
 0x2df   :  { %790 = vsyncpa [#allocation9 + $0x1], 1 }
 0x2e0   :  { %791 = vsyncpa [#allocation4], 1 }
 0x2e1   :  { %793 = vsyncpa [#allocation4 + $0x1], 1 }
 0x2e2   :  { %794 = vsyncpa [#allocation12], 1 }
 0x2e3   :  { %796 = vsyncpa [#allocation12 + $0x1], 1 }
 0x2e4   :  { %797 = vsyncpa [#allocation15], 1 }
 0x2e5   :  { %799 = vsyncpa [#allocation15 + $0x1], 1 }

</bundles_post_ra>
